<compile_context>
chip_gen: v7x
topology: tpu7x:2x2x1
jax: 0.10.0
libtpu: 0.0.40
codegen_flags: <defaults>
</compile_context>

<pallas_src>
import functools
import math

import jax
import jax.numpy as jnp
from jax.experimental import pallas as pl
from jax.experimental.pallas import tpu as pltpu

ALPHA = 0.05
LANES = 128


def _cdiv(a, b):
    return -(-a // b)


def _tpu_kind():
    try:
        return (jax.devices()[0].device_kind or "").lower()
    except Exception:
        return ""


def _bce_blur_kernel(pred_ref, true_ref, out_ref, *,
                     steps, total_tiles, block_rows,
                     valid_full_rows, rem_lanes,
                     inv_alpha, mask_last, has_dummy, approx_recip):
    c = pl.program_id(0)   # parallel axis (TensorCore shard)
    i = pl.program_id(1)   # arbitrary axis (reduction over tiles)

    @pl.when(i == 0)
    def _():
        out_ref[...] = jnp.zeros_like(out_ref)

    x = pred_ref[...].astype(jnp.float32)
    t = true_ref[...].astype(jnp.float32)

    # Shared transcendental: e = exp(-|x|) feeds both the stable BCE log-term
    # and sigmoid(x) (saves one exp per element).
    e = jnp.exp(-jnp.abs(x))
    d = 1.0 + e
    if approx_recip:
        # v7x: approximate EUP reciprocal + one Newton step on the VPU.
        r = pl.reciprocal(d, approx=True)
        inv_d = r * (2.0 - d * r)
    else:
        inv_d = 1.0 / d
    # Numerically stable BCE-with-logits (== torch.nn.BCEWithLogitsLoss):
    #   max(x, 0) - x*t + log1p(exp(-|x|))
    bce = jnp.maximum(x, 0.0) - x * t + jnp.log1p(e)
    p = jnp.where(x >= 0.0, inv_d, e * inv_d)              # sigmoid(x)
    af = 1.0 - jnp.exp((p - t - 1.0) * inv_alpha)          # alpha factor
    loss = bce * af

    def _acc(l):
        if block_rows % 8 == 0:
            # Full-vreg (8,128) accumulation: the reshape is layout-preserving
            # and the leading-axis sum is plain VPU adds (no XLU, no masked
            # partial stores).
            out_ref[...] += l.reshape(block_rows // 8, 8, LANES).sum(axis=0)
        else:
            # Tiny single-tile fallback (block_rows < 8, runs once).
            out_ref[0:1, :] += jnp.sum(l, axis=0, keepdims=True)

    if not (mask_last or has_dummy):
        _acc(loss)
    else:
        tile = c * steps + i
        last = total_tiles - 1

        @pl.when(tile < last)
        def _():
            _acc(loss)

        @pl.when(tile == last)
        def _():
            if mask_last:
                # Only the final real tile pays for mask math.  Selecting 0.0
                # also discards NaN/Inf produced from the unspecified rows past
                # the array edge (grid over-coverage) or from zero padding.
                row0 = last * block_rows       # static offset
                row = row0 + jax.lax.broadcasted_iota(
                    jnp.int32, (block_rows, LANES), 0)
                valid = row < valid_full_rows
                if rem_lanes:
                    lane = jax.lax.broadcasted_iota(
                        jnp.int32, (block_rows, LANES), 1)
                    valid = valid | ((row == valid_full_rows) &
                                     (lane < rem_lanes))
                _acc(jnp.where(valid, loss, 0.0))
            else:
                _acc(loss)
        # tile > last (dummy grid point on an odd 2-core split): contributes
        # nothing.


def bce_blur_with_logits_loss(pred, true, alpha=ALPHA, *,
                              max_block_rows=None, n_cores=None):
    assert pred.shape == true.shape
    n_elems = math.prod(pred.shape)
    if n_elems == 0:
        return jnp.array(jnp.nan, jnp.float32)

    kind = _tpu_kind()
    is_v7x = "v7" in kind

    flat_p = jnp.ravel(pred)
    flat_t = jnp.ravel(true)

    # Pad only the (<128-element) ragged lane remainder; never to a tile
    # multiple.  For the common case (n_elems % 128 == 0) no HBM copy is made
    # at all -- ravel + reshape below are free.
    rem_lanes = n_elems % LANES
    if rem_lanes:
        pad = LANES - rem_lanes
        flat_p = jnp.pad(flat_p, (0, pad))
        flat_t = jnp.pad(flat_t, (0, pad))
    rows = _cdiv(n_elems, LANES)
    p2 = flat_p.reshape(rows, LANES)
    t2 = flat_t.reshape(rows, LANES)

    # Per-generation tile sizing: ~4 MiB per input tile on v7x (64 MiB VMEM),
    # ~8 MiB on v5e/v6e (128 MiB VMEM).  bf16 inputs double the row count.
    itemsize = max(jnp.dtype(pred.dtype).itemsize,
                   jnp.dtype(true.dtype).itemsize)
    if max_block_rows is None:
        target_tile_bytes = (4 if is_v7x else 8) * 1024 * 1024
        max_block_rows = max(8, (target_tile_bytes // (LANES * itemsize)) // 8 * 8)

    if rows <= max_block_rows:
        block_rows = rows          # full-dim block: always legal, single tile
        total_tiles = 1
    else:
        block_rows = max_block_rows
        total_tiles = _cdiv(rows, block_rows)

    # Two TensorCores only on v7x (v5e/v6e have a single TC per chip).
    if n_cores is None:
        n_cores = 2 if (is_v7x and total_tiles >= 2) else 1
    n_cores = max(1, min(n_cores, total_tiles))
    steps = _cdiv(total_tiles, n_cores)
    has_dummy = n_cores * steps != total_tiles
    mask_last = (rem_lanes != 0) or (total_tiles * block_rows != rows)

    kernel = functools.partial(
        _bce_blur_kernel,
        steps=steps,
        total_tiles=total_tiles,
        block_rows=block_rows,
        valid_full_rows=n_elems // LANES,
        rem_lanes=rem_lanes,
        inv_alpha=1.0 / (float(alpha) + 1e-4),
        mask_last=mask_last,
        has_dummy=has_dummy,
        approx_recip=is_v7x,
    )

    if has_dummy:
        # Dummy grid points (odd tile count split over 2 cores) clamp onto the
        # last real tile; their contribution is skipped in-kernel.
        in_map = lambda c, i: (jnp.minimum(c * steps + i, total_tiles - 1), 0)
    else:
        in_map = lambda c, i: (c * steps + i, 0)

    vmem_limit = (40 if is_v7x else 64) * 1024 * 1024

    partials = pl.pallas_call(
        kernel,
        out_shape=jax.ShapeDtypeStruct((n_cores * 8, LANES), jnp.float32),
        grid_spec=pltpu.PrefetchScalarGridSpec(
            num_scalar_prefetch=0,
            grid=(n_cores, steps),
            in_specs=[
                pl.BlockSpec((block_rows, LANES), in_map),
                pl.BlockSpec((block_rows, LANES), in_map),
            ],
            out_specs=pl.BlockSpec((8, LANES), lambda c, i: (c, 0)),
        ),
        compiler_params=pltpu.CompilerParams(
            dimension_semantics=("parallel", "arbitrary"),
            vmem_limit_bytes=vmem_limit,
        ),
    )(p2, t2)

    # Tiny (n_cores*8*128) cross-lane collapse + mean normalization in JAX.
    return jnp.sum(partials) * (1.0 / n_elems)


def _reference(pred, true, alpha=ALPHA):
    x = pred.astype(jnp.float32)
    t = true.astype(jnp.float32)
    bce = jnp.maximum(x, 0.0) - x * t + jnp.log1p(jnp.exp(-jnp.abs(x)))
    p = jax.nn.sigmoid(x)
    dx = p - t
    af = 1.0 - jnp.exp((dx - 1.0) / (alpha + 0.0001))
    return jnp.mean(bce * af)


if __name__ == "__main__":
    key = jax.random.PRNGKey(0)
    k1, k2, k3, k4, k5, k6 = jax.random.split(key, 6)

    # 1) Small NCHW case: single tile, zero-copy fast path (N % 128 == 0).
    x = jax.random.normal(k1, (2, 4, 16, 16), dtype=jnp.float32)
    t = (jax.random.uniform(k2, (2, 4, 16, 16)) > 0.5).astype(jnp.float32)
    out = jax.block_until_ready(bce_blur_with_logits_loss(x, t))
    ref = _reference(x, t)
    assert jnp.allclose(out, ref, atol=1e-5, rtol=1e-4), (out, ref)

    # 2) Forced multi-tile / 2-core / odd-tile-count path: exercises grid
    #    over-coverage masking and dummy-tile skipping with tiny data.
    x2 = jax.random.normal(k3, (2, 5, 16, 16), dtype=jnp.float32)   # rows=20
    t2 = (jax.random.uniform(k4, (2, 5, 16, 16)) > 0.5).astype(jnp.float32)
    out2 = jax.block_until_ready(
        bce_blur_with_logits_loss(x2, t2, max_block_rows=8, n_cores=2))
    ref2 = _reference(x2, t2)
    assert jnp.allclose(out2, ref2, atol=1e-5, rtol=1e-4), (out2, ref2)

    # 3) Ragged size (N % 128 != 0): exercises the lane-remainder mask path.
    x3 = jax.random.normal(k5, (7, 11, 5), dtype=jnp.float32)       # 385 elems
    t3 = (jax.random.uniform(k6, (7, 11, 5)) > 0.5).astype(jnp.float32)
    out3 = jax.block_until_ready(bce_blur_with_logits_loss(x3, t3))
    ref3 = _reference(x3, t3)
    assert jnp.allclose(out3, ref3, atol=1e-5, rtol=1e-4), (out3, ref3)

    print("KERNEL_OK")
</pallas_src>

<mosaic_0001>
module attributes {stable_mosaic.version = 11 : i64} {
  func.func @_bce_blur_kernel(%arg0: i32, %arg1: i32, %arg2: memref<16x128xf32, #tpu.memory_space<vmem>>, %arg3: memref<16x128xf32, #tpu.memory_space<vmem>>, %arg4: memref<8x128xf32, #tpu.memory_space<vmem>>) attributes {dimension_semantics = [#tpu.dimension_semantics<parallel>, #tpu.dimension_semantics<arbitrary>], iteration_bounds = array<i64: 1, 1>, scalar_prefetch = 0 : i64, scratch_operands = 0 : i64, tpu.core_type = #tpu.core_type<tc>, window_params = [{transform_indices = @transform_0, window_bounds = array<i64: 16, 128>}, {transform_indices = @transform_1, window_bounds = array<i64: 16, 128>}, {transform_indices = @transform_2, window_bounds = array<i64: 8, 128>}]} {
    %c0_i32 = arith.constant 0 : i32
    %0 = arith.cmpi eq, %arg1, %c0_i32 : i32
    %1 = arith.extui %0 : i1 to i32
    %c0_i32_0 = arith.constant 0 : i32
    %2 = arith.cmpi ne, %1, %c0_i32_0 : i32
    scf.if %2 {
      %cst_16 = arith.constant 0.000000e+00 : f32
      %37 = vector.broadcast %cst_16 : f32 to vector<8x128xf32>
      %c0_17 = arith.constant 0 : index
      %c0_18 = arith.constant 0 : index
      %38 = vector.load %arg4[%c0_17, %c0_18] : memref<8x128xf32, #tpu.memory_space<vmem>>, vector<8x128xf32>
      tpu.vector_store %arg4[%c0_17, %c0_18], %37 {strides = array<i32>} : memref<8x128xf32, #tpu.memory_space<vmem>>, vector<8x128xf32>,
    } else {
    }
    %c0 = arith.constant 0 : index
    %c0_1 = arith.constant 0 : index
    %3 = vector.load %arg2[%c0, %c0_1] : memref<16x128xf32, #tpu.memory_space<vmem>>, vector<16x128xf32>
    %c0_2 = arith.constant 0 : index
    %c0_3 = arith.constant 0 : index
    %4 = vector.load %arg3[%c0_2, %c0_3] : memref<16x128xf32, #tpu.memory_space<vmem>>, vector<16x128xf32>
    %5 = math.absf %3 : vector<16x128xf32>
    %cst = arith.constant 0.000000e+00 : f32
    %6 = vector.broadcast %cst : f32 to vector<16x128xf32>
    %7 = arith.subf %6, %5 : vector<16x128xf32>
    %8 = math.exp %7 : vector<16x128xf32>
    %cst_4 = arith.constant 1.000000e+00 : f32
    %9 = vector.broadcast %cst_4 : f32 to vector<16x128xf32>
    %10 = arith.addf %9, %8 : vector<16x128xf32>
    %cst_5 = arith.constant 1.000000e+00 : f32
    %11 = vector.broadcast %cst_5 : f32 to vector<16x128xf32>
    %12 = arith.divf %11, %10 : vector<16x128xf32>
    %cst_6 = arith.constant 0.000000e+00 : f32
    %13 = vector.broadcast %cst_6 : f32 to vector<16x128xf32>
    %14 = arith.maximumf %3, %13 : vector<16x128xf32>
    %15 = arith.mulf %3, %4 : vector<16x128xf32>
    %16 = arith.subf %14, %15 : vector<16x128xf32>
    %17 = math.log1p %8 : vector<16x128xf32>
    %18 = arith.addf %16, %17 : vector<16x128xf32>
    %cst_7 = arith.constant 0.000000e+00 : f32
    %19 = vector.broadcast %cst_7 : f32 to vector<16x128xf32>
    %20 = arith.cmpf oge, %3, %19 : vector<16x128xf32>
    %21 = arith.mulf %8, %12 : vector<16x128xf32>
    %22 = arith.select %20, %12, %21 : vector<16x128xi1>, vector<16x128xf32>
    %23 = arith.subf %22, %4 : vector<16x128xf32>
    %cst_8 = arith.constant 1.000000e+00 : f32
    %24 = vector.broadcast %cst_8 : f32 to vector<16x128xf32>
    %25 = arith.subf %23, %24 : vector<16x128xf32>
    %cst_9 = arith.constant 19.9600792 : f32
    %26 = vector.broadcast %cst_9 : f32 to vector<16x128xf32>
    %27 = arith.mulf %25, %26 : vector<16x128xf32>
    %28 = math.exp %27 : vector<16x128xf32>
    %cst_10 = arith.constant 1.000000e+00 : f32
    %29 = vector.broadcast %cst_10 : f32 to vector<16x128xf32>
    %30 = arith.subf %29, %28 : vector<16x128xf32>
    %31 = arith.mulf %18, %30 : vector<16x128xf32>
    %c0_11 = arith.constant 0 : index
    %c0_12 = arith.constant 0 : index
    %32 = vector.load %arg4[%c0_11, %c0_12] : memref<8x128xf32, #tpu.memory_space<vmem>>, vector<8x128xf32>
    %33 = vector.shape_cast %31 : vector<16x128xf32> to vector<2x8x128xf32>
    %cst_13 = arith.constant dense<0.000000e+00> : vector<8x128xf32>
    %34 = vector.multi_reduction <add>, %33, %cst_13 [0] : vector<2x8x128xf32> to vector<8x128xf32>
    %35 = arith.addf %32, %34 : vector<8x128xf32>
    %c0_14 = arith.constant 0 : index
    %c0_15 = arith.constant 0 : index
    %36 = vector.load %arg4[%c0_14, %c0_15] : memref<8x128xf32, #tpu.memory_space<vmem>>, vector<8x128xf32>
    tpu.vector_store %arg4[%c0_14, %c0_15], %35 {strides = array<i32>} : memref<8x128xf32, #tpu.memory_space<vmem>>, vector<8x128xf32>,
    return
  }
  func.func @transform_0(%arg0: i32, %arg1: i32) -> (i32, i32) {
    %c1_i32 = arith.constant 1 : i32
    %0 = arith.muli %arg0, %c1_i32 : i32
    %1 = arith.addi %0, %arg1 : i32
    %c0_i32 = arith.constant 0 : i32
    %c0_i32_0 = arith.constant 0 : i32
    return %1, %c0_i32 : i32, i32
  }
  func.func @transform_1(%arg0: i32, %arg1: i32) -> (i32, i32) {
    %c1_i32 = arith.constant 1 : i32
    %0 = arith.muli %arg0, %c1_i32 : i32
    %1 = arith.addi %0, %arg1 : i32
    %c0_i32 = arith.constant 0 : i32
    %c0_i32_0 = arith.constant 0 : i32
    return %1, %c0_i32 : i32, i32
  }
  func.func @transform_2(%arg0: i32, %arg1: i32) -> (i32, i32) {
    %c0_i32 = arith.constant 0 : i32
    %c0_i32_0 = arith.constant 0 : i32
    return %arg0, %c0_i32 : i32, i32
  }
}

</mosaic_0001>

<bundles_post_ra>
// kernel: tpu_custom_call.1
= control target key start
LH: loop header
LB: loop body
LE: loop exit
PB: predicated region body
PF: predicated region fallthrough
CT: control target
= control target key end

     0   :  { %7 = vsyncpa [#allocation3], 0  ;;  %s293_s0 = inlined_call_operand.hbm [shape: f32[16,128], index: 0, kind: input, shape index: {}]   ;;  %s294_s1 = inlined_call_operand.hbm [shape: f32[16,128], index: 1, kind: input, shape index: {}]   ;;  %s295_s2 = inlined_call_operand.hbm [shape: f32[8,128], index: 2, kind: output, shape index: {}]  }
   0x1   :  { %8 = vsyncpa [#allocation6], 0 }
   0x2   :  { %9 = vsyncpa [#allocation4], 0  ;;  %s237_s9 = smov [#allocation2]   ;;  %s165_s13 = scalar_lea.hbm %s293_s0, 256 }
   0x3   :  { %s19_s10 = sshll.u32 %s237_s9, 4  ;;  %p166_p0 = scmp.ne.s32.totalorder %s293_s0, %s165_s13  ;;  %s20_s10 = int_to_ptr.vmem [resolvable:$true] %s19_s10 }
   0x4   :  { %p169_p1 = scmp.lt.u32.totalorder %s165_s13, %s293_s0 }
   0x6   :  { %p171_p2 = pnand %p169_p1, %p166_p0 }
   0x8   :  { %174 = shalt.err (!%p171_p2)
}
   0x9   :  { %s175_s18 = scalar_lea.vmem %s20_s10, 256  ;;  %p180_p4 = scmp.lt.s32.totalorder %s20_s10, %s20_s10 }
   0xa   :  { %p176_p3 = scmp.ne.s32.totalorder %s20_s10, %s175_s18  ;;  %p181_p5 = scmp.lt.s32.totalorder %s175_s18, %s175_s18 }
   0xc   :  { %p182_p6 = por %p181_p5, %p180_p4 }
   0xe   :  { %p183_p7 = pnand %p182_p6, %p176_p3 }
  0x10   :  { %186 = shalt.err (!%p183_p7)
}
  0x11   :  { %s238_s19 = smov 128   ;;  %s239_s20 = smov 8  }
  0x12   :  { %25 = dma.hbm_to_vmem [thread:$0]  %s293_s0, 256, %s20_s10, [#allocation3], %s238_s19, %s238_s19, %s239_s20  }
  0x13   :  { %s240_s23 = smov [#allocation5]   ;;  %s187_s27 = scalar_lea.hbm %s294_s1, 256 }
  0x14   :  { %s35_s24 = sshll.u32 %s240_s23, 4  ;;  %p188_p8 = scmp.ne.s32.totalorder %s294_s1, %s187_s27  ;;  %s36_s24 = int_to_ptr.vmem [resolvable:$true] %s35_s24 }
  0x15   :  { %p191_p9 = scmp.lt.u32.totalorder %s187_s27, %s294_s1 }
  0x17   :  { %p193_p10 = pnand %p191_p9, %p188_p8 }
  0x19   :  { %196 = shalt.err (!%p193_p10)
}
  0x1a   :  { %s197_s4 = scalar_lea.vmem %s36_s24, 256  ;;  %p202_p12 = scmp.lt.s32.totalorder %s36_s24, %s36_s24 }
  0x1b   :  { %p198_p11 = scmp.ne.s32.totalorder %s36_s24, %s197_s4  ;;  %p203_p13 = scmp.lt.s32.totalorder %s197_s4, %s197_s4 }
  0x1d   :  { %p204_p0 = por %p203_p13, %p202_p12 }
  0x1f   :  { %p205_p1 = pnand %p204_p0, %p198_p11 }
  0x21   :  { %208 = shalt.err (!%p205_p1)
}
  0x22   :  { %41 = dma.hbm_to_vmem [thread:$0]  %s294_s1, 256, %s36_s24, [#allocation6], %s238_s19, %s238_s19, %s239_s20  }
  0x23   :  { %231 = dma.done.wait [#allocation3], 256  }
  0x24   :  { %232 = vsyncadd [#allocation3], 4294967040 }
  0x25   :  { %233 = dma.done.wait [#allocation6], 256  }
  0x26   :  { %234 = vsyncadd [#allocation6], 4294967040  ;;  %v57_v0 = vld [vmem:[#allocation2] sm:$0xff]  ;;  %v58_v1 = vld [vmem:[#allocation2 + $0x8] sm:$0xff]  ;;  %s241_s1 = smov [#allocation7]  }
  0x27   :  { %v61_v2 = vand.u32 2147483647, %v57_v0  ;;  %v62_v3 = vand.u32 2147483647, %v58_v1  ;;  %vm101_vm0 = vcmp.ge.f32.partialorder %v57_v0, 0.0  ;;  %v59_v14 = vld [vmem:[#allocation5] sm:$0xff] }
  0x28   :  { %vm102_vm1 = vcmp.ge.f32.partialorder %v58_v1, 0.0  ;;  %v60_v16 = vld [vmem:[#allocation5 + $0x8] sm:$0xff]  ;;  %v75_v36 = vmax.f32 %v57_v0, 0.0  ;;  %v77_v37 = vmul.f32 %v59_v14, %v57_v0  ;;  %v76_v38 = vmax.f32 %v58_v1, 0.0  ;;  %s131_s6 = sshll.u32 %s241_s1, 4  ;;  %s132_s6 = int_to_ptr.vmem [resolvable:$true] %s131_s6 }
  0x29   :  { %v63_v4 = vsub.f32 0.0, %v61_v2  ;;  %v64_v5 = vsub.f32 0.0, %v62_v3  ;;  %v78_v39 = vmul.f32 %v60_v16, %v58_v1  ;;  %s209_s7 = scalar_lea.vmem %s132_s6, 128  ;;  %p214_p3 = scmp.lt.s32.totalorder %s132_s6, %s132_s6 }
  0x2a   :  { %v79_v44 = vsub.f32 %v75_v36, %v77_v37  ;;  %p210_p2 = scmp.ne.s32.totalorder %s132_s6, %s209_s7  ;;  %p215_p4 = scmp.lt.s32.totalorder %s209_s7, %s209_s7 }
  0x2b   :  { %v65_v6 = vmul.f32 1.442695, %v63_v4  ;;  %v67_v7 = vmul.f32 1.442695, %v64_v5  ;;  %v80_v45 = vsub.f32 %v76_v38, %v78_v39 }
  0x2c   :  { %p216_p5 = por %p215_p4, %p214_p3 }
  0x2d   :  { %149 = vpow2.f32 %v65_v6 }
  0x2e   :  { %151 = vpow2.f32 %v67_v7  ;;  %p217_p6 = pnand %p216_p5, %p210_p2 }
  0x37   :  { %v150_v8 = vpop.eup %149 }
  0x38   :  { %v152_v9 = vpop.eup %151  ;;  %v69_v10 = vadd.f32 1.0, %v150_v8  ;;  %v84_v22 = vmul.f32 -0.5, %v150_v8  ;;  %v87_v31 = vand.u32 2147483647, %v150_v8 }
  0x39   :  { %v70_v11 = vadd.f32 1.0, %v152_v9  ;;  %v93_v24 = vmul.f32 -0.5, %v152_v9  ;;  %v96_v35 = vand.u32 2147483647, %v152_v9 }
  0x3a   :  { %153 = vrcp.f32 %v69_v10  ;;  %v85_v28 = vadd.f32 1.0, %v84_v22  ;;  %vm88_vm2 = vcmp.lt.f32.partialorder %v87_v31, 0.0004427343 }
  0x3b   :  { %155 = vrcp.f32 %v70_v11  ;;  %v94_v32 = vadd.f32 1.0, %v93_v24  ;;  %vm97_vm3 = vcmp.lt.f32.partialorder %v96_v35, 0.0004427343 }
  0x3c   :  { %157 = vlog2.f32 %v69_v10  ;;  %v86_v41 = vmul.f32 %v150_v8, %v85_v28 }
  0x3d   :  { %159 = vlog2.f32 %v70_v11  ;;  %v95_v43 = vmul.f32 %v152_v9, %v94_v32 }
  0x44   :  { %v154_v12 = vpop.eup %153 }
  0x45   :  { %v156_v13 = vpop.eup %155  ;;  %v103_v15 = vmul.f32 %v154_v12, %v150_v8 }
  0x46   :  { %v104_v17 = vmul.f32 %v156_v13, %v152_v9  ;;  %v158_v30 = vpop.eup %157 }
  0x47   :  { %v105_v18 = vsel %vm101_vm0, %v154_v12, %v103_v15  ;;  %v160_v34 = vpop.eup %159  ;;  %v83_v40 = vmul.f32 0.6931472, %v158_v30 }
  0x48   :  { %v106_v19 = vsel %vm102_vm1, %v156_v13, %v104_v17  ;;  %v107_v20 = vsub.f32 %v105_v18, %v59_v14  ;;  %v92_v42 = vmul.f32 0.6931472, %v160_v34 }
  0x49   :  { %v108_v21 = vsub.f32 %v106_v19, %v60_v16  ;;  %v89_v46 = vsel %vm88_vm2, %v86_v41, %v83_v40 }
  0x4a   :  { %v141_v23 = vadd.f32 -1.0, %v107_v20  ;;  %v98_v47 = vsel %vm97_vm3, %v95_v43, %v92_v42  ;;  %v99_v48 = vadd.f32 %v89_v46, %v79_v44 }
  0x4b   :  { %v142_v25 = vadd.f32 -1.0, %v108_v21  ;;  %v100_v50 = vadd.f32 %v98_v47, %v80_v45 }
  0x4c   :  { %v111_v26 = vmul.f32 19.96008, %v141_v23 }
  0x4d   :  { %v112_v27 = vmul.f32 19.96008, %v142_v25 }
  0x4e   :  { %v113_v29 = vmul.f32 1.442695, %v111_v26 }
  0x4f   :  { %v115_v33 = vmul.f32 1.442695, %v112_v27 }
  0x50   :  { %161 = vpow2.f32 %v113_v29 }
  0x51   :  { %163 = vpow2.f32 %v115_v33 }
  0x5a   :  { %v162_v49 = vpop.eup %161 }
  0x5b   :  { %v164_v51 = vpop.eup %163  ;;  %v117_v52 = vsub.f32 1.0, %v162_v49 }
  0x5c   :  { %v118_v53 = vsub.f32 1.0, %v164_v51 }
  0x5d   :  { %v119_v54 = vmul.f32 %v117_v52, %v99_v48 }
  0x5e   :  { %v120_v55 = vmul.f32 %v118_v53, %v100_v50 }
  0x60   :  { %v122_v56 = vadd.f32 %v120_v55, %v119_v54 }
  0x62   :  { %124 = vst [vmem:[#allocation7] sm:$0xff] %v122_v56 }
  0x63   :  { %220 = shalt.err (!%p217_p6)
}
  0x64   :  { %s221_s10 = scalar_lea.hbm %s295_s2, 128 }
  0x65   :  { %p222_p7 = scmp.ne.s32.totalorder %s295_s2, %s221_s10  ;;  %p225_p8 = scmp.lt.u32.totalorder %s221_s10, %s295_s2 }
  0x67   :  { %p227_p9 = pnand %p225_p8, %p222_p7 }
  0x69   :  { %230 = shalt.err (!%p227_p9)
}
  0x6a   :  { %134 = dma.vmem_to_hbm [thread:$0]  %s132_s6, 128, %s295_s2, [#allocation4]  }
  0x6b   :  { %235 = dma.done.wait [#allocation4], 128  }
  0x6c   :  { %236 = vsyncadd [#allocation4], 4294967168 }
  0x6d   :  { %138 = vsyncpa [#allocation3], 1 }
  0x6e   :  { %139 = vsyncpa [#allocation6], 1 }
  0x6f   :  { %140 = vsyncpa [#allocation4], 1 }

</bundles_post_ra>
